<compile_context>
chip_gen: v5e
topology: v5e:2x2
jax: 0.10.0
libtpu: 0.0.40
codegen_flags: <defaults>
</compile_context>

<pallas_src>
import functools

import jax
import jax.numpy as jnp
from jax.experimental import pallas as pl
from jax.experimental.pallas import tpu as pltpu


_DEFAULT_VMEM_CAP = 64 * 1024 * 1024  # safe lower bound (v7x per-TC physical)


def _vmem_limit_bytes():
    """Scoped-VMEM limit requested from Mosaic: ~3/4 of physical capacity."""
    try:
        cap = int(pltpu.get_tpu_info().vmem_capacity_bytes)
    except Exception:
        cap = _DEFAULT_VMEM_CAP
    return max(16 * 1024 * 1024, min(cap * 3 // 4, 100 * 1024 * 1024))


# --------------------------------------------------------------------------- #
# Fused single-pass kernel: GAP -> fc1 -> ReLU -> fc2 -> sigmoid -> rescale
# --------------------------------------------------------------------------- #
def _se_fused_kernel(x_ref, w1_ref, w2_ref, o_ref, *, inv_s):
    # x_ref : (BT, C, S)   BT images, channels in sublanes, spatial in lanes
    # w1_ref: (H, C) == fc1.weight (out, in);  w2_ref: (C, H) == fc2.weight
    x = x_ref[...]
    xf = x.astype(jnp.float32)

    # Squeeze: AdaptiveAvgPool3d(1) == mean over all D*H*W (f32 accumulation).
    pooled = jnp.sum(xf, axis=-1) * inv_s                         # (BT, C)

    # Excitation: contract on the 'in' dim so weights keep nn.Linear layout.
    w1 = w1_ref[...].astype(jnp.float32)                          # (H, C)
    w2 = w2_ref[...].astype(jnp.float32)                          # (C, H)
    h = jax.lax.dot_general(pooled, w1, (((1,), (1,)), ((), ())),
                            preferred_element_type=jnp.float32)   # (BT, H)
    h = jnp.maximum(h, 0.0)
    y = jax.lax.dot_general(h, w2, (((1,), (1,)), ((), ())),
                            preferred_element_type=jnp.float32)   # (BT, C)
    y = jax.nn.sigmoid(y)

    # Scale: broadcast the per-(image, channel) gate over all spatial lanes;
    # multiply in f32 (exact on v5e which lacks a bf16 VPU) and store x.dtype.
    o_ref[...] = (xf * y[:, :, None]).astype(o_ref.dtype)


# --------------------------------------------------------------------------- #
# Tiled two-phase fallback (per-image slab does not fit VMEM)
# --------------------------------------------------------------------------- #
def _se_pool_gate_kernel(x_ref, w1_ref, w2_ref, gate_ref, acc_ref, *, inv_s):
    # Phase 0: accumulate per-channel sums over spatial tiles; on the last
    # tile compute the sigmoid gate.  The SE vector stays a (C, 1) column the
    # whole way (channels in sublanes) -> no lane<->sublane relayout.
    si = pl.program_id(1)

    @pl.when(si == 0)
    def _():
        acc_ref[...] = jnp.zeros_like(acc_ref)

    acc_ref[...] += jnp.sum(x_ref[0].astype(jnp.float32), axis=-1, keepdims=True)

    @pl.when(si == pl.num_programs(1) - 1)
    def _():
        pooled = acc_ref[...] * inv_s                               # (C, 1)
        w1 = w1_ref[...].astype(jnp.float32)                        # (H, C)
        w2 = w2_ref[...].astype(jnp.float32)                        # (C, H)
        h = jnp.maximum(
            jnp.dot(w1, pooled, preferred_element_type=jnp.float32), 0.0)  # (H,1)
        y = jax.nn.sigmoid(
            jnp.dot(w2, h, preferred_element_type=jnp.float32))            # (C,1)
        gate_ref[0] = y


def _se_scale_kernel(gate_ref, x_ref, o_ref):
    # Phase 1: rescale one (C, TS) spatial tile by the resident (C, 1) gate.
    g = gate_ref[0]                                                 # (C, 1) f32
    o_ref[0] = (x_ref[0].astype(jnp.float32) * g).astype(o_ref.dtype)


# --------------------------------------------------------------------------- #
# Wrapper
# --------------------------------------------------------------------------- #
def _pick_images_per_step(b, per_image_bytes, budget):
    fitting = [t for t in range(1, b + 1)
               if b % t == 0 and t * per_image_bytes <= budget]
    if not fitting:
        return None
    # Prefer the largest packing that still leaves >= 2 grid steps so the
    # BlockSpec pipeline has something to overlap and v7x megacore can split.
    multi = [t for t in fitting if b // t >= 2]
    return max(multi) if multi else max(fitting)


def se_layer_forward(x, w1, w2, *, block_vmem_budget_bytes=None):
    """SELayer forward (matches the PyTorch module's semantics).

    x  : (b, c, d, h, w), float32 or bfloat16 (output keeps x's dtype)
    w1 : (c // reduction, c)  == fc1.weight   (nn.Linear (out, in) layout)
    w2 : (c, c // reduction)  == fc2.weight
    block_vmem_budget_bytes : optional override of the block-sizing budget
        (used to force / test the tiled fallback); the compiler VMEM limit
        itself always tracks the hardware.
    """
    b, c, d, h, w = x.shape
    s = d * h * w
    hidden = w1.shape[0]
    assert w1.shape == (hidden, c) and w2.shape == (c, hidden)

    itemsize = x.dtype.itemsize
    vmem_limit = _vmem_limit_bytes()
    budget = (block_vmem_budget_bytes if block_vmem_budget_bytes is not None
              else int(vmem_limit * 0.8))

    # Per image: 2x double-buffered input + 2x double-buffered output slabs,
    # plus one transient f32 copy (only real when x is bf16) -- conservative.
    per_image_bytes = c * s * (4 * itemsize + 4)

    x2 = x.reshape(b, c, s)          # contiguous NCDHW view, no data movement
    inv_s = 1.0 / float(s)

    bt = _pick_images_per_step(b, per_image_bytes, budget)

    if bt is not None:
        # ---- fused single pass: x read from HBM once, written once --------
        out = pl.pallas_call(
            functools.partial(_se_fused_kernel, inv_s=inv_s),
            out_shape=jax.ShapeDtypeStruct((b, c, s), x.dtype),
            grid=(b // bt,),
            in_specs=[
                pl.BlockSpec((bt, c, s), lambda i: (i, 0, 0)),
                pl.BlockSpec((hidden, c), lambda i: (0, 0)),   # VMEM-resident
                pl.BlockSpec((c, hidden), lambda i: (0, 0)),   # VMEM-resident
            ],
            out_specs=pl.BlockSpec((bt, c, s), lambda i: (i, 0, 0)),
            compiler_params=pltpu.CompilerParams(
                dimension_semantics=("parallel",),
                vmem_limit_bytes=vmem_limit,
            ),
        )(x2, w1, w2)
        return out.reshape(b, c, d, h, w)

    # ---- spatial-tiled two-phase fallback ----------------------------------
    # Phase 0: per-channel partial sums over spatial tiles -> gate (b, c, 1).
    # Phase 1: rescale spatial tiles by the gate.  ~1.5x the HBM traffic of
    # the fused path, but never hits the VMEM wall (relevant on v7x / large
    # CT volumes).
    ts = (budget // (c * (4 * itemsize + 4))) // 128 * 128
    ts = max(128, ts)
    ts = min(ts, pl.cdiv(s, 128) * 128)
    s_pad = pl.cdiv(s, ts) * ts
    n_s = s_pad // ts
    if s_pad != s:
        # Zero pad: mean stays exact (divided by the true s), tiles stay
        # lane-dense, padded tail is sliced away below.
        x2 = jnp.pad(x2, ((0, 0), (0, 0), (0, s_pad - s)))

    gate = pl.pallas_call(
        functools.partial(_se_pool_gate_kernel, inv_s=inv_s),
        out_shape=jax.ShapeDtypeStruct((b, c, 1), jnp.float32),
        grid=(b, n_s),
        in_specs=[
            pl.BlockSpec((1, c, ts), lambda bi, si: (bi, 0, si)),
            pl.BlockSpec((hidden, c), lambda bi, si: (0, 0)),
            pl.BlockSpec((c, hidden), lambda bi, si: (0, 0)),
        ],
        out_specs=pl.BlockSpec((1, c, 1), lambda bi, si: (bi, 0, 0)),
        scratch_shapes=[pltpu.VMEM((c, 1), jnp.float32)],
        compiler_params=pltpu.CompilerParams(
            dimension_semantics=("parallel", "arbitrary"),
            vmem_limit_bytes=vmem_limit,
        ),
    )(x2, w1, w2)

    out = pl.pallas_call(
        _se_scale_kernel,
        out_shape=jax.ShapeDtypeStruct((b, c, s_pad), x.dtype),
        grid=(b, n_s),
        in_specs=[
            pl.BlockSpec((1, c, 1), lambda bi, si: (bi, 0, 0)),   # gate resident
            pl.BlockSpec((1, c, ts), lambda bi, si: (bi, 0, si)),
        ],
        out_specs=pl.BlockSpec((1, c, ts), lambda bi, si: (bi, 0, si)),
        compiler_params=pltpu.CompilerParams(
            dimension_semantics=("parallel", "parallel"),
            vmem_limit_bytes=vmem_limit,
        ),
    )(gate, x2)

    if s_pad != s:
        out = out[:, :, :s]
    return out.reshape(b, c, d, h, w)


# --------------------------------------------------------------------------- #
# Pure-JAX reference (mirrors the PyTorch module) for correctness checks
# --------------------------------------------------------------------------- #
def _se_layer_ref(x, w1, w2):
    y = jnp.mean(x, axis=(2, 3, 4))                     # (b, c) global avg pool
    y = jnp.maximum(y @ w1.T, 0.0)                      # fc1 (bias=False) + ReLU
    y = jax.nn.sigmoid(y @ w2.T)                        # fc2 (bias=False) + sigmoid
    return x * y[:, :, None, None, None]                # channel-wise rescale


if __name__ == "__main__":
    key = jax.random.PRNGKey(0)
    kx, k1, k2 = jax.random.split(key, 3)

    # Small shapes consistent with SELayer's 5D forward: (b, c, d, h, w).
    b, c, d, h, w = 2, 64, 4, 16, 16
    reduction = 16                       # module default
    hidden = c // reduction              # = 4

    x = jax.random.normal(kx, (b, c, d, h, w), jnp.float32)
    # nn.Linear weights in their native (out, in) layout.
    w1 = jax.random.normal(k1, (hidden, c), jnp.float32) * (1.0 / c) ** 0.5
    w2 = jax.random.normal(k2, (c, hidden), jnp.float32) * (1.0 / hidden) ** 0.5

    ref = _se_layer_ref(x, w1, w2)

    # 1) fused single-pass path (f32)
    out = jax.block_until_ready(se_layer_forward(x, w1, w2))
    assert out.shape == x.shape, out.shape
    assert bool(jnp.all(jnp.isfinite(out)))
    assert bool(jnp.allclose(out, ref, rtol=1e-4, atol=1e-5)), "fused path mismatch"

    # 2) spatial-tiled two-phase fallback (forced via a tiny block budget),
    #    also exercises the 128-lane padding.
    out_t = jax.block_until_ready(
        se_layer_forward(x, w1, w2, block_vmem_budget_bytes=512 * 1024))
    assert out_t.shape == x.shape
    assert bool(jnp.allclose(out_t, ref, rtol=1e-4, atol=1e-5)), "tiled path mismatch"

    # 3) bf16 I/O end-to-end (fused path), f32 accumulation inside the kernel.
    xb = x.astype(jnp.bfloat16)
    w1b = w1.astype(jnp.bfloat16)
    w2b = w2.astype(jnp.bfloat16)
    out_b = jax.block_until_ready(se_layer_forward(xb, w1b, w2b))
    assert out_b.dtype == jnp.bfloat16
    ref_b = _se_layer_ref(xb.astype(jnp.float32), w1b.astype(jnp.float32),
                          w2b.astype(jnp.float32))
    assert bool(jnp.allclose(out_b.astype(jnp.float32), ref_b,
                             rtol=3e-2, atol=3e-2)), "bf16 path mismatch"

    print("KERNEL_OK")
</pallas_src>

<mosaic_0001>
module attributes {stable_mosaic.version = 11 : i64} {
  func.func @_se_fused_kernel(%arg0: i32, %arg1: memref<1x64x1024xf32, #tpu.memory_space<vmem>>, %arg2: memref<4x64xf32, #tpu.memory_space<vmem>>, %arg3: memref<64x4xf32, #tpu.memory_space<vmem>>, %arg4: memref<1x64x1024xf32, #tpu.memory_space<vmem>>) attributes {dimension_semantics = [#tpu.dimension_semantics<parallel>], iteration_bounds = array<i64: 2>, scalar_prefetch = 0 : i64, scratch_operands = 0 : i64, tpu.core_type = #tpu.core_type<tc>, window_params = [{transform_indices = @transform_0, window_bounds = array<i64: 1, 64, 1024>}, {pipeline_mode = #tpu.pipeline_mode<synchronous>, transform_indices = @transform_1, window_bounds = array<i64: 4, 64>}, {pipeline_mode = #tpu.pipeline_mode<synchronous>, transform_indices = @transform_2, window_bounds = array<i64: 64, 4>}, {transform_indices = @transform_3, window_bounds = array<i64: 1, 64, 1024>}]} {
    %c0 = arith.constant 0 : index
    %c0_0 = arith.constant 0 : index
    %c0_1 = arith.constant 0 : index
    %0 = vector.load %arg1[%c0, %c0_0, %c0_1] : memref<1x64x1024xf32, #tpu.memory_space<vmem>>, vector<1x64x1024xf32>
    %cst = arith.constant dense<0.000000e+00> : vector<1x64xf32>
    %1 = vector.multi_reduction <add>, %0, %cst [2] : vector<1x64x1024xf32> to vector<1x64xf32>
    %cst_2 = arith.constant 9.765625E-4 : f32
    %2 = vector.broadcast %cst_2 : f32 to vector<1x64xf32>
    %3 = arith.mulf %1, %2 : vector<1x64xf32>
    %c0_3 = arith.constant 0 : index
    %c0_4 = arith.constant 0 : index
    %4 = vector.load %arg2[%c0_3, %c0_4] : memref<4x64xf32, #tpu.memory_space<vmem>>, vector<4x64xf32>
    %c0_5 = arith.constant 0 : index
    %c0_6 = arith.constant 0 : index
    %5 = vector.load %arg3[%c0_5, %c0_6] : memref<64x4xf32, #tpu.memory_space<vmem>>, vector<64x4xf32>
    %cst_7 = arith.constant dense<0.000000e+00> : vector<1x4xf32>
    %6 = tpu.matmul %3, %4, %cst_7 {dimension_numbers = #tpu.dot_dimension_numbers<[1], [1], [0], [0], [0, 0, 1, 0], [], []>} : vector<1x64xf32>, vector<4x64xf32>, vector<1x4xf32> -> vector<1x4xf32>
    %cst_8 = arith.constant 0.000000e+00 : f32
    %7 = vector.broadcast %cst_8 : f32 to vector<1x4xf32>
    %8 = arith.maximumf %6, %7 : vector<1x4xf32>
    %cst_9 = arith.constant dense<0.000000e+00> : vector<1x64xf32>
    %9 = tpu.matmul %8, %5, %cst_9 {dimension_numbers = #tpu.dot_dimension_numbers<[1], [1], [0], [0], [0, 0, 1, 0], [], []>} : vector<1x4xf32>, vector<64x4xf32>, vector<1x64xf32> -> vector<1x64xf32>
    %10 = arith.negf %9 : vector<1x64xf32>
    %11 = math.exp %10 : vector<1x64xf32>
    %cst_10 = arith.constant 1.000000e+00 : f32
    %12 = vector.broadcast %cst_10 : f32 to vector<1x64xf32>
    %13 = arith.addf %12, %11 : vector<1x64xf32>
    %14 = arith.divf %12, %13 : vector<1x64xf32>
    %15 = vector.shape_cast %14 : vector<1x64xf32> to vector<1x64x1xf32>
    %16 = vector.broadcast %15 : vector<1x64x1xf32> to vector<1x64x1024xf32>
    %17 = arith.mulf %0, %16 : vector<1x64x1024xf32>
    %c0_11 = arith.constant 0 : index
    %c0_12 = arith.constant 0 : index
    %c0_13 = arith.constant 0 : index
    %18 = vector.load %arg4[%c0_11, %c0_12, %c0_13] : memref<1x64x1024xf32, #tpu.memory_space<vmem>>, vector<1x64x1024xf32>
    tpu.vector_store %arg4[%c0_11, %c0_12, %c0_13], %17 {strides = array<i32>} : memref<1x64x1024xf32, #tpu.memory_space<vmem>>, vector<1x64x1024xf32>,
    return
  }
  func.func @transform_0(%arg0: i32) -> (i32, i32, i32) {
    %c0_i32 = arith.constant 0 : i32
    %c0_i32_0 = arith.constant 0 : i32
    %c0_i32_1 = arith.constant 0 : i32
    return %arg0, %c0_i32, %c0_i32_0 : i32, i32, i32
  }
  func.func @transform_1(%arg0: i32) -> (i32, i32) {
    %c0_i32 = arith.constant 0 : i32
    %c0_i32_0 = arith.constant 0 : i32
    %c0_i32_1 = arith.constant 0 : i32
    return %c0_i32, %c0_i32_0 : i32, i32
  }
  func.func @transform_2(%arg0: i32) -> (i32, i32) {
    %c0_i32 = arith.constant 0 : i32
    %c0_i32_0 = arith.constant 0 : i32
    %c0_i32_1 = arith.constant 0 : i32
    return %c0_i32, %c0_i32_0 : i32, i32
  }
  func.func @transform_3(%arg0: i32) -> (i32, i32, i32) {
    %c0_i32 = arith.constant 0 : i32
    %c0_i32_0 = arith.constant 0 : i32
    %c0_i32_1 = arith.constant 0 : i32
    return %arg0, %c0_i32, %c0_i32_0 : i32, i32, i32
  }
}

</mosaic_0001>

<bundles_post_ra>
// kernel: tpu_custom_call.1
= control target key start
LH: loop header
LB: loop body
LE: loop exit
PB: predicated region body
PF: predicated region fallthrough
CT: control target
= control target key end

     0   :  { %8 = vsyncpa [#allocation3], 0  ;;  %s1514_s0 = inlined_call_operand.hbm [shape: f32[2,64,1024], index: 0, kind: input, shape index: {}]   ;;  %s1515_s1 = inlined_call_operand.vmem [shape: f32[4,64], index: 1, kind: input, shape index: {}]   ;;  %s1516_s2 = inlined_call_operand.vmem [shape: f32[64,4], index: 2, kind: input, shape index: {}]   ;;  %s1517_s3 = inlined_call_operand.hbm [shape: f32[2,64,1024], index: 3, kind: output, shape index: {}]  }
   0x1   :  { %10 = vsyncpa [#allocation3 + $0x1], 0 }
   0x2   :  { %11 = vsyncpa [#allocation4], 0 }
   0x3   :  { %13 = vsyncpa [#allocation4 + $0x1], 0  ;;  %s956_s12 = smov 0   ;;  %s958_s13 = smov 0  }
   0x4   :  { %s960_s14 = smov 0   ;;  %s962_s15 = smov 0  }
   0x5 LB: > { %s977_s16 = sadd.s32 4294967295, %s930_s15   ;;  %s743_s17 = sadd.s32 4294967294, %s930_s15   ;;  %s930_s15 = sphi %s962_s15, %s1599_s15   ;;  %s926_s14 = sphi %s960_s14, %s1598_s14   ;;  %s922_s13 = sphi %s958_s13, %s1597_s13   ;;  %s918_s12 = sphi %s956_s12, %s1596_s12  }
   0x6   : > { %s981_s18 = sadd.s32 1, %s930_s15   ;;  %s26_s19 = sadd.s32 1, %s926_s14 }
   0x7   : > { %s23_s20 = ssub.s32 %s930_s15, %s981_s18  ;;  %p33_p0 = scmp.ne.s32.totalorder %s926_s14, %s922_s13 }
   0x8   : > { %p24_p1 = scmp.eq.s32.totalorder %s23_s20, 0  ;;  %p34_p2 = scmp.eq.s32.totalorder %s930_s15, 0 }
   0x9   : > { %p39_p3 = scmp.ne.s32.totalorder %s922_s13, %s918_s12  ;;  %p40_p4 = scmp.eq.s32.totalorder %s977_s16, 0 }
   0xa   : > { %s993_s21 = scalar_select %p24_p1, %s926_s14, %s26_s19  }
   0xb   : > { %p995_p5 = por %p34_p2, %p33_p0  ;;  %p999_p6 = por %p40_p4, %p39_p3 }
   0xc   : > { %p105_p7 = scmp.eq.s32.totalorder %s977_s16, 1  ;;  %p111_p8 = scmp.eq.s32.totalorder %s743_s17, 1 }
   0xd   : > { %p783_p10 = scmp.lt.s32.totalorder %s930_s15, 2  ;;  %s137_s26 = sand.u32 1, %s926_s14  }
   0xe   : > { %p1006_p11 = por %p105_p7, %p33_p0  ;;  %p1010_p12 = por %p111_p8, %p39_p3 }
   0xf   : > { %s769_s27 = sshll.u32 %s930_s15, 9  ;;  %s746_s28 = sshll.u32 %s137_s26, 9 }
  0x10   : > { %s146_s4 = scalar_lea.hbm %s1514_s0, %s769_s27  ;;  %s141_s6 = scalar_lea.vmem [#allocation2], %s746_s28 }
  0x11   : > { %s147_s5 = sshll.u32 %s146_s4, 4  ;;  %s149_s7 = sshll.u32 %s141_s6, 4  ;;  %s148_s5 = int_to_ptr.hbm [resolvable:$true] %s147_s5  ;;  %s150_s7 = int_to_ptr.vmem [resolvable:$true] %s149_s7 }
  0x12   : > { %p1021_p13 = pnand %p783_p10, %p995_p5  ;;  %p749_p0 = scmp.ge.s32.totalorder %s930_s15, 1 }
  0x13   : > { %p157_p1 = scmp.lt.s32.totalorder %s930_s15, 3  ;;  %s138_s9 = scalar_lea.sflag [#allocation3], %s137_s26 }
  0x14   : > { %s834_s10 = sshra.s32 %s148_s5, 4  ;;  %p838_p3 = pneg %p1021_p13  ;;  %s835_s10 = int_to_ptr.hbm [resolvable:$true] %s834_s10 }
  0x15   : > { %s836_s11 = scalar_lea.hbm %s835_s10, 512  ;;  %s841_s20 = scalar_lea.hbm %s1514_s0, 1024 }
  0x16   : > { %p837_p2 = scmp.ne.s32.totalorder %s835_s10, %s836_s11  ;;  %p842_p5 = scmp.lt.s32.totalorder %s835_s10, %s1514_s0 }
  0x17   : > { %p843_p8 = scmp.lt.s32.totalorder %s841_s20, %s836_s11 }
  0x18   : > { %p839_p4 = pnand %p838_p3, %p837_p2 }
  0x19   : > { %p844_p10 = por %p843_p8, %p842_p5 }
  0x1a   : > { %p840_p7 = pneg %p839_p4 }
  0x1c   : > { %p845_p9 = pnand %p844_p10, %p840_p7 }
  0x1e   : > { %848 = shalt.err (!%p845_p9)
}
  0x1f   : > { %s932_s26 = smov 1024   ;;  %s933_s28 = smov 64  }
  0x20   : > { %778 = dma.hbm_to_vmem [thread:$0]  (!%p1021_p13), %s148_s5, 8192, %s150_s7, %s138_s9, %s932_s26, %s932_s26, %s933_s28  }
  0x21   : > { %p158_p2 = pnand %p749_p0, %p157_p1 }
  0x23   : > { %161 = sbr.rel (%p158_p2) target bundleno = 653 (0x28d), region = 32 }
  0x28   : > { %s1042_s29 = sand.u32 1, %s922_s13  }
  0x29   : > { %s750_s30 = sshll.u32 %s1042_s29, 9  ;;  %s164_s4 = scalar_lea.sflag [#allocation3], %s1042_s29 }
  0x2a   : > { %s1048_s6 = scalar_lea.vmem [#allocation2], %s750_s30 }
  0x2b   : > { %909 = dma.done.wait (%p999_p6), %s164_s4, 8192  }
  0x2c   : > { %911 = vsyncadd (%p999_p6), %s164_s4, 4294959104  ;;  %v1055_v0 = vld [vmem:[%s1048_s6] sm:$0xff]  ;;  %v1058_v1 = vld [vmem:[%s1048_s6 + $0x8] sm:$0xff]  ;;  %vm383_vm0 = vcmask 523264   ;;  %vm410_vm1 = vcmask 31744   ;;  %vm357_vm2 = vcmask 130112  }
  0x2d   : > { %v1061_v2 = vld [vmem:[%s1048_s6 + $0x10] sm:$0xff]  ;;  %v255_v3 = vadd.f32 %v1058_v1, %v1055_v0  ;;  %v1066_v4 = vld [vmem:[%s1048_s6 + $0x18] sm:$0xff]  ;;  %v1069_v5 = vld [vmem:[%s1048_s6 + $0x80] sm:$0xff]  ;;  %vm361_vm3 = vcmask 195712   ;;  %vm365_vm4 = vcmask 261312   ;;  %vm369_vm5 = vcmask 326912  }
  0x2e   : > { %v1073_v7 = vld [vmem:[%s1048_s6 + $0x88] sm:$0xff]  ;;  %v1076_v8 = vld [vmem:[%s1048_s6 + $0x90] sm:$0xff]  ;;  %v1079_v9 = vld [vmem:[%s1048_s6 + $0x20] sm:$0xff]  ;;  %vm373_vm6 = vcmask 392512   ;;  %vm377_vm7 = vcmask 458112   ;;  %vm381_vm8 = vcmask 523712  }
  0x2f   : > { %v256_v6 = vadd.f32 %v255_v3, %v1061_v2  ;;  %v273_v10 = vadd.f32 %v1073_v7, %v1069_v5  ;;  %v1085_v12 = vld [vmem:[%s1048_s6 + $0x98] sm:$0xff]  ;;  %v1088_v13 = vld [vmem:[%s1048_s6 + $0x100] sm:$0xff]  ;;  %v1091_v14 = vld [vmem:[%s1048_s6 + $0x108] sm:$0xff]  ;;  %s1355_s7 = scalar_lea.vmem [#allocation5], %s750_s30  ;;  %s770_s30 = sshll.u32 %s977_s16, 9 }
  0x30   : > { %v1094_v15 = vld [vmem:[%s1048_s6 + $0x28] sm:$0xff]  ;;  %v1098_v17 = vld [vmem:[%s1048_s6 + $0x110] sm:$0xff]  ;;  %v291_v18 = vadd.f32 %v1091_v14, %v1088_v13  ;;  %v1107_v21 = vld [vmem:[%s1048_s6 + $0xa0] sm:$0xff]  ;;  %s666_s10 = scalar_lea.hbm %s1517_s3, %s770_s30  ;;  %s667_s16 = sshll.u32 %s1355_s7, 4  ;;  %s668_s16 = int_to_ptr.vmem [resolvable:$true] %s667_s16 }
  0x31   : > { %v257_v11 = vadd.f32 %v256_v6, %v1066_v4  ;;  %v274_v16 = vadd.f32 %v273_v10, %v1076_v8  ;;  %v1103_v19 = vld [vmem:[%s1048_s6 + $0x30] sm:$0xff]  ;;  %v1110_v22 = vld [vmem:[%s1048_s6 + $0x118] sm:$0xff]  ;;  %v1115_v25 = vld [vmem:[%s1048_s6 + $0x40] sm:$0xff]  ;;  %s669_s11 = sshll.u32 %s666_s10, 4  ;;  %s655_s17 = scalar_lea.sflag [#allocation4], %s1042_s29  ;;  %s670_s11 = int_to_ptr.hbm [resolvable:$true] %s669_s11 }
  0x32   : > { %v292_v24 = vadd.f32 %v291_v18, %v1098_v17  ;;  %v1118_v26 = vld [vmem:[%s1048_s6 + $0x48] sm:$0xff]  ;;  %v1121_v27 = vld [vmem:[%s1048_s6 + $0x50] sm:$0xff]  ;;  %v1124_v28 = vld [vmem:[%s1048_s6 + $0x38] sm:$0xff]  ;;  %s878_s19 = sshra.s32 %s670_s11, 4  ;;  %s884_s26 = scalar_lea.hbm %s1517_s3, 1024  ;;  %s879_s19 = int_to_ptr.hbm [resolvable:$true] %s878_s19 }
  0x33   : > { %v258_v20 = vadd.f32 %v257_v11, %v1079_v9  ;;  %v275_v23 = vadd.f32 %v274_v16, %v1085_v12  ;;  %v1128_v30 = vld [vmem:[%s1048_s6 + $0xa8] sm:$0xff]  ;;  %v1131_v31 = vld [vmem:[%s1048_s6 + $0x120] sm:$0xff]  ;;  %v264_v32 = vadd.f32 %v1118_v26, %v1115_v25  ;;  %v1136_v33 = vld [vmem:[%s1048_s6 + $0xb0] sm:$0xff]  ;;  %s880_s20 = scalar_lea.hbm %s879_s19, 512  ;;  %p885_p0 = scmp.lt.s32.totalorder %s879_s19, %s1517_s3 }
  0x34   : > { %v293_v35 = vadd.f32 %v292_v24, %v1110_v22  ;;  %v1141_v36 = vld [vmem:[%s1048_s6 + $0x58] sm:$0xff]  ;;  %v1144_v37 = vld [vmem:[%s1048_s6 + $0xc0] sm:$0xff]  ;;  %v1148_v39 = vld [vmem:[%s1048_s6 + $0x128] sm:$0xff]  ;;  %p881_p6 = scmp.ne.s32.totalorder %s879_s19, %s880_s20  ;;  %p886_p1 = scmp.lt.s32.totalorder %s884_s26, %s880_s20 }
  0x35   : > { %v259_v29 = vadd.f32 %v258_v20, %v1094_v15  ;;  %v276_v34 = vadd.f32 %v275_v23, %v1107_v21  ;;  %v265_v40 = vadd.f32 %v264_v32, %v1121_v27  ;;  %v1152_v41 = vld [vmem:[%s1048_s6 + $0xc8] sm:$0xff]  ;;  %v1155_v42 = vld [vmem:[%s1048_s6 + $0xd0] sm:$0xff]  ;;  %v1158_v43 = vld [vmem:[%s1048_s6 + $0xb8] sm:$0xff] }
  0x36   : > { %v1162_v45 = vld [vmem:[%s1048_s6 + $0x130] sm:$0xff]  ;;  %v294_v46 = vadd.f32 %v293_v35, %v1131_v31  ;;  %v1166_v47 = vld [vmem:[%s1048_s6 + $0x60] sm:$0xff]  ;;  %v282_v48 = vadd.f32 %v1152_v41, %v1144_v37  ;;  %v1173_v51 = vld [vmem:[%s1048_s6 + $0xd8] sm:$0xff]  ;;  %p882_p9 = pnand %p881_p6, %p1006_p11  ;;  %p887_p3 = por %p886_p1, %p885_p0 }
  0x37   : > { %v260_v38 = vadd.f32 %v259_v29, %v1103_v19  ;;  %v277_v44 = vadd.f32 %v276_v34, %v1128_v30  ;;  %v266_v50 = vadd.f32 %v265_v40, %v1141_v36  ;;  %v1176_v52 = vld [vmem:[%s1048_s6 + $0x140] sm:$0xff]  ;;  %v1179_v53 = vld [vmem:[%s1048_s6 + $0x148] sm:$0xff]  ;;  %v1183_v55 = vld [vmem:[%s1048_s6 + $0x138] sm:$0xff] }
  0x38   : > { %1547 = vst [vmem:[#allocation8_spill] sm:$0xff] %v1176_v52  ;;  %v295_v56 = vadd.f32 %v294_v46, %v1148_v39  ;;  %v1187_v57 = vld [vmem:[%s1048_s6 + $0x68] sm:$0xff]  ;;  %v283_v58 = vadd.f32 %v282_v48, %v1155_v42  ;;  %v1191_v59 = vld [vmem:[%s1048_s6 + $0x150] sm:$0xff]  ;;  %v300_v60 = vadd.f32 %v1179_v53, %v1176_v52  ;;  %v1200_v63 = vld [vmem:[%s1048_s6 + $0xe0] sm:$0xff]  ;;  %p883_p13 = pneg %p882_p9 }
  0x39   : > { %v261_v49 = vadd.f32 %v260_v38, %v1124_v28  ;;  %1548 = vst [vmem:[#allocation9_spill] sm:$0xff] %v1179_v53  ;;  %v278_v54 = vadd.f32 %v277_v44, %v1136_v33  ;;  %v1196_v61 = vld [vmem:[%s1048_s6 + $0x70] sm:$0xff]  ;;  %v267_v62 = vadd.f32 %v266_v50, %v1166_v47  ;;  %v1203_v3 = vld [vmem:[%s1048_s6 + $0x158] sm:$0xff]  ;;  %v1210_v18 = vld [vmem:[%s1048_s6 + $0x180] sm:$0xff] }
  0x3a   : > { %1549 = vst [vmem:[#allocation10_spill] sm:$0xff] %v1191_v59  ;;  %v296_v10 = vadd.f32 %v295_v56, %v1162_v45  ;;  %v284_v11 = vadd.f32 %v283_v58, %v1173_v51  ;;  %v301_v16 = vadd.f32 %v300_v60, %v1191_v59  ;;  %v1213_v20 = vld [vmem:[%s1048_s6 + $0x188] sm:$0xff]  ;;  %v1216_v23 = vld [vmem:[%s1048_s6 + $0x190] sm:$0xff]  ;;  %v1219_v24 = vld [vmem:[%s1048_s6 + $0x78] sm:$0xff]  ;;  %p888_p4 = pnand %p887_p3, %p883_p13 }
  0x3b   : > { %262 = vadd.xlane.f32.xlu0 %v261_v49  ;;  %1550 = vst [vmem:[#allocation11_spill] sm:$0xff] %v1203_v3  ;;  %v279_v6 = vadd.f32 %v278_v54, %v1158_v43  ;;  %v268_v29 = vadd.f32 %v267_v62, %v1187_v57  ;;  %v1223_v32 = vld [vmem:[%s1048_s6 + $0xe8] sm:$0xff]  ;;  %v1226_v34 = vld [vmem:[%s1048_s6 + $0x160] sm:$0xff]  ;;  %v309_v35 = vadd.f32 %v1213_v20, %v1210_v18  ;;  %v1232_v40 = vld [vmem:[%s1048_s6 + $0xf0] sm:$0xff] }
  0x3c   : > { %1551 = vst [vmem:[#allocation12_spill] sm:$0xff] %v1210_v18  ;;  %v297_v38 = vadd.f32 %v296_v10, %v1183_v55  ;;  %v285_v44 = vadd.f32 %v284_v11, %v1200_v63  ;;  %v302_v46 = vadd.f32 %v301_v16, %v1203_v3  ;;  %v1237_v48 = vld [vmem:[%s1048_s6 + $0x198] sm:$0xff]  ;;  %v1240_v49 = vld [vmem:[%s1048_s6 + $0x1c0] sm:$0xff]  ;;  %v1244_v54 = vld [vmem:[%s1048_s6 + $0x168] sm:$0xff] }
  0x3d   : > { %1552 = vst [vmem:[#allocation13_spill] sm:$0xff] %v1213_v20  ;;  %280 = vadd.xlane.f32.xlu1 %v279_v6  ;;  %v269_v50 = vadd.f32 %v268_v29, %v1196_v61  ;;  %v310_v56 = vadd.f32 %v309_v35, %v1216_v23  ;;  %v1248_v58 = vld [vmem:[%s1048_s6 + $0x1c8] sm:$0xff]  ;;  %v1251_v60 = vld [vmem:[%s1048_s6 + $0x1d0] sm:$0xff]  ;;  %v1256_v10 = vld [vmem:[%s1048_s6 + $0x1a0] sm:$0xff] }
  0x3e   : > { %1553 = vst [vmem:[#allocation14_spill] sm:$0xff] %v1216_v23  ;;  %298 = vadd.xlane.f32.xlu2 %v297_v38  ;;  %v286_v62 = vadd.f32 %v285_v44, %v1223_v32  ;;  %v303_v6 = vadd.f32 %v302_v46, %v1226_v34  ;;  %v318_v11 = vadd.f32 %v1248_v58, %v1240_v49  ;;  %v1262_v29 = vld [vmem:[%s1048_s6 + $0xf8] sm:$0xff]  ;;  %v1265_v35 = vld [vmem:[%s1048_s6 + $0x170] sm:$0xff]  ;;  %v1274_v20 = vld [vmem:[%s1048_s6 + $0x1a8] sm:$0xff] }
  0x3f   : > { %1554 = vst [vmem:[#allocation15_spill] sm:$0xff] %v1226_v34  ;;  %v270_v16 = vadd.f32 %v269_v50, %v1219_v24  ;;  %v311_v38 = vadd.f32 %v310_v56, %v1237_v48  ;;  %v1269_v23 = vld [vmem:[%s1048_s6 + $0x1d8] sm:$0xff]  ;;  %v1282_v18 = vld [vmem:[%s1048_s6 + $0x1e0] sm:$0xff] }
  0x40   : > { %1555 = vst [vmem:[#allocation16_spill] sm:$0xff] %v1237_v48  ;;  %v287_v44 = vadd.f32 %v286_v62, %v1232_v40  ;;  %v304_v46 = vadd.f32 %v303_v6, %v1244_v54  ;;  %v1278_v50 = vld [vmem:[%s1048_s6 + $0x178] sm:$0xff]  ;;  %v1287_v48 = vld [vmem:[%s1048_s6 + $0x1b0] sm:$0xff] }
  0x41   : > { %1556 = vst [vmem:[#allocation17_spill] sm:$0xff] %v1240_v49  ;;  %v312_v49 = vadd.f32 %v311_v38, %v1256_v10 }
  0x42   : > { %1557 = vst [vmem:[#allocation18_spill] sm:$0xff] %v1244_v54  ;;  %v288_v56 = vadd.f32 %v287_v44, %v1262_v29  ;;  %v305_v62 = vadd.f32 %v304_v46, %v1265_v35  ;;  %v1301_v44 = vld [vmem:[%s1048_s6 + $0x1f0] sm:$0xff] }
  0x43   : > { %1558 = vst [vmem:[#allocation19_spill] sm:$0xff] %v1248_v58  ;;  %v319_v58 = vadd.f32 %v318_v11, %v1251_v60  ;;  %271 = vadd.xlane.f32.xlu0 %v270_v16  ;;  %v313_v54 = vadd.f32 %v312_v49, %v1274_v20  ;;  %v1292_v11 = vld [vmem:[%s1048_s6 + $0x1e8] sm:$0xff] }
  0x44   : > { %1559 = vst [vmem:[#allocation20_spill] sm:$0xff] %v1251_v60  ;;  %v306_v16 = vadd.f32 %v305_v62, %v1278_v50  ;;  %v1296_v60 = vld [vmem:[%s1048_s6 + $0x1b8] sm:$0xff]  ;;  %v335_v62 = vld [vmem:[%s1515_s1] sm:$0xf] }
  0x45   : > { %1560 = vst [vmem:[#allocation21_spill] sm:$0xff] %v1256_v10  ;;  %v320_v6 = vadd.f32 %v319_v58, %v1269_v23  ;;  %289 = vadd.xlane.f32.xlu1 %v288_v56  ;;  %v314_v10 = vadd.f32 %v313_v54, %v1287_v48  ;;  %752 = vmatpush.xpose.msk.msra.mxu0 %vm383_vm0, %v335_v62  ;;  %v343_v54 = vld [vmem:[%s1516_s2 + $0x38] sm:$0xff] }
  0x46   : > { %1561 = vst [vmem:[#allocation22_spill] sm:$0xff] %v1265_v35  ;;  %307 = vadd.xlane.f32.xlu2 %v306_v16  ;;  %754 = vmatpush.xpose.msk.msra.mxu1 %vm410_vm1, %v343_v54  ;;  %v352_v16 = vlaneseq }
  0x47   : > { %1562 = vst [vmem:[#allocation23_spill] sm:$0xff] %v1269_v23  ;;  %v321_v38 = vadd.f32 %v320_v6, %v1282_v18  ;;  %v315_v58 = vadd.f32 %v314_v10, %v1296_v60  ;;  %v1306_v23 = vld [vmem:[%s1048_s6 + $0x1f8] sm:$0xff]  ;;  %v342_v10 = vld [vmem:[%s1516_s2 + $0x30] sm:$0xff]  ;;  %v341_v6 = vld [vmem:[%s1516_s2 + $0x28] sm:$0xff] }
  0x48   : > { %1563 = vst [vmem:[#allocation24_spill] sm:$0xff] %v1274_v20 }
  0x49   : > { %1564 = vst [vmem:[#allocation25_spill] sm:$0xff] %v1278_v50  ;;  %v322_v46 = vadd.f32 %v321_v38, %v1292_v11 }
  0x4a   : > { %1565 = vst [vmem:[#allocation26_spill] sm:$0xff] %v1282_v18  ;;  %755 = vmatpush.xpose.msk.msra.mxu1 %vm410_vm1, %v342_v10  ;;  %v339_v10 = vld [vmem:[%s1516_s2 + $0x18] sm:$0xff] }
  0x4b   : > { %1566 = vst [vmem:[#allocation27_spill] sm:$0xff] %v1287_v48  ;;  %v323_v49 = vadd.f32 %v322_v46, %v1301_v44  ;;  %316 = vadd.xlane.f32.xlu0 %v315_v58  ;;  %v340_v58 = vld [vmem:[%s1516_s2 + $0x20] sm:$0xff] }
  0x4c   : > { %1567 = vst [vmem:[#allocation28_spill] sm:$0xff] %v1292_v11 }
  0x4d   : > { %1568 = vst [vmem:[#allocation29_spill] sm:$0xff] %v1296_v60  ;;  %v324_v56 = vadd.f32 %v323_v49, %v1306_v23  ;;  %v353_v49 = vand.u32 127, %v352_v16 }
  0x4e   : > { %1569 = vst [vmem:[#allocation30_spill] sm:$0xff] %v1301_v44  ;;  %756 = vmatpush.xpose.msk.msra.mxu1 %vm410_vm1, %v341_v6 }
  0x4f   : > { %1570 = vst [vmem:[#allocation31_spill] sm:$0xff] %v1306_v23  ;;  %325 = vadd.xlane.f32.xlu1 %v324_v56  ;;  %v355_v54 = vadd.s32 4294967288, %v353_v49  ;;  %v359_v23 = vadd.s32 4294967280, %v353_v49  ;;  %v367_v6 = vadd.s32 4294967264, %v353_v49  ;;  %v363_v60 = vadd.s32 4294967272, %v353_v49 }
  0x50   : > { %v371_v3 = vadd.s32 4294967256, %v353_v49 }
  0x52   : > { %757 = vmatpush.xpose.msk.msra.mxu1 %vm410_vm1, %v340_v58 }
  0x56   : > { %758 = vmatpush.xpose.msk.msra.mxu1 %vm410_vm1, %v339_v10 }
  0xae   : > { %v263_v38 = vpop.xlane.xlu0 %262 }
  0xaf   : > { %v327_v62 = vmul.f32 0.0009765625, %v263_v38  ;;  %v338_v38 = vld [vmem:[%s1516_s2 + $0x10] sm:$0xff] }
  0xb0   : > { %v281_v46 = vpop.xlane.xlu1 %280  ;;  %759 = vmatpush.xpose.msk.msra.mxu1 %vm410_vm1, %v338_v38 }
  0xb1   : > { %v299_v56 = vpop.xlane.xlu2 %298  ;;  %v329_v44 = vmul.f32 0.0009765625, %v281_v46  ;;  %v354_v48 = vperm.slane %v327_v62, %v353_v49  ;;  %v337_v62 = vld [vmem:[%s1516_s2 + $0x8] sm:$0xff] }
  0xb2   : > { %v331_v20 = vmul.f32 0.0009765625, %v299_v56 }
  0xb3   : > { %v360_v35 = vperm.slane %v329_v44, %v359_v23 }
  0xb4   : > { %v368_v56 = vperm.slane %v331_v20, %v367_v6  ;;  %760 = vmatpush.xpose.msk.msra.mxu1 %vm410_vm1, %v337_v62 }
  0xb6   : > { %v272_v11 = vpop.xlane.xlu0 %271 }
  0xb7   : > { %v328_v18 = vmul.f32 0.0009765625, %v272_v11 }
  0xb8   : > { %v290_v58 = vpop.xlane.xlu1 %289 }
  0xb9   : > { %v356_v50 = vperm.slane %v328_v18, %v355_v54  ;;  %v330_v34 = vmul.f32 0.0009765625, %v290_v58  ;;  %v308_v11 = vpop.xlane.xlu2 %307  ;;  %v375_v18 = vadd.s32 4294967248, %v353_v49 }
  0xba   : > { %v332_v52 = vmul.f32 0.0009765625, %v308_v11 }
  0xbb   : > { %v358_v46 = vsel %vm357_vm2, %v356_v50, %v354_v48  ;;  %v364_v53 = vperm.slane %v330_v34, %v363_v60  ;;  %v379_v48 = vadd.s32 4294967240, %v353_v49 }
  0xbc   : > { %v362_v59 = vsel %vm361_vm3, %v360_v35, %v358_v46  ;;  %v372_v10 = vperm.slane %v332_v52, %v371_v3  ;;  %v336_v52 = vld [vmem:[%s1516_s2] sm:$0xff]  ;;  %v479_v3 = vshrl.u32 %v352_v16, 7 }
  0xbd   : > { %v366_v54 = vsel %vm365_vm4, %v364_v53, %v362_v59  ;;  %761 = vmatpush.xpose.msk.msra.mxu1 %vm410_vm1, %v336_v52 }
  0xbe   : > { %v317_v23 = vpop.xlane.xlu0 %316  ;;  %v370_v58 = vsel %vm369_vm5, %v368_v56, %v366_v54  ;;  %821 = vset.pattern.permute.xlu2 %v479_v3  ;;  %v492_v49 = vadd.s32 16, %v479_v3  ;;  %v486_v46 = vadd.s32 8, %v479_v3  ;;  %v504_v52 = vadd.s32 32, %v479_v3 }
  0xbf   : > { %v333_v44 = vmul.f32 0.0009765625, %v317_v23  ;;  %v374_v50 = vsel %vm373_vm6, %v372_v10, %v370_v58 }
  0xc0   : > { %823 = vset.pattern.permute.xlu1 %v492_v49  ;;  %822 = vset.pattern.permute.xlu0 %v486_v46 }
  0xc1   : > { %v376_v34 = vperm.slane %v333_v44, %v375_v18 }
  0xc2   : > { %v326_v60 = vpop.xlane.xlu1 %325 }
  0xc3   : > { %v334_v35 = vmul.f32 0.0009765625, %v326_v60  ;;  %v378_v20 = vsel %vm377_vm7, %v376_v34, %v374_v50 }
  0xc5   : > { %v380_v6 = vperm.slane %v334_v35, %v379_v48 }
  0xc7   : > { %v382_v38 = vsel %vm381_vm8, %v380_v6, %v378_v20  ;;  %v510_v20 = vadd.s32 40, %v479_v3  ;;  %v498_v6 = vadd.s32 24, %v479_v3 }
  0xc8   : > { %753 = vmatmul.msk.f32.vlgmr.msra.gmra.mxu0 %vm383_vm0, %v382_v38  ;;  %v522_v38 = vadd.s32 56, %v479_v3 }
 0x145   : > { %v406_v53 = vpop.f32.mrf.mxu0 }
 0x146   : > { %v409_v59 = vmax.f32 %v406_v53, 0.0  ;;  %v516_v53 = vadd.s32 48, %v479_v3 }
 0x148   : > { %762 = vmatmul.msk.f32.vlgmr.msra.gmra.mxu1 %vm410_vm1, %v409_v59 }
 0x1c5   : > { %v455_v11 = vpop.f32.mrf.mxu1 }
 0x1c6   : > { %v763_v56 = vmul.f32 -1.442695, %v455_v11 }
 0x1c8   : > { %830 = vpow2.f32 %v763_v56 }
 0x1ce   : > { %v831_v18 = vpop.eup %830 }
 0x1cf   : > { %v461_v62 = vadd.f32 1.0, %v831_v18 }
 0x1d1   : > { %832 = vrcp.f32 %v461_v62  ;;  %v473_v44 = vand.u32 2147483648, %v461_v62  ;;  %v471_v48 = vand.u32 2147483647, %v461_v62  ;;  %vm467_vm10 = vweird.f32 %v461_v62 }
 0x1d3   : > { %v474_v16 = vor.u32 1.1754944e-38, %v473_v44  ;;  %vm472_vm12 = vcmp.eq.f32.partialorder %v471_v48, 8.507059e+37 }
 0x1d7   : > { %v833_v54 = vpop.eup %832 }
 0x1d8   : > { %v463_v10 = vmul.f32 %v833_v54, %v461_v62  ;;  %vm468_vm9 = vweird.f32 %v833_v54 }
 0x1d9   : > { %vm469_vm11 = vmor %vm467_vm10, %vm468_vm9 }
 0x1da   : > { %v464_v23 = vsub.f32 1.0, %v463_v10 }
 0x1dc   : > { %v465_v58 = vmul.f32 %v833_v54, %v464_v23 }
 0x1de   : > { %v466_v34 = vadd.f32 %v833_v54, %v465_v58 }
 0x1e0   : > { %v470_v60 = vsel %vm469_vm11, %v833_v54, %v466_v34 }
 0x1e1   : > { %v475_v35 = vsel %vm472_vm12, %v474_v16, %v470_v60  ;;  %v1575_v16 = vld [vmem:[#allocation15_spill] sm:$0xff]  ;;  %v1576_v60 = vld [vmem:[#allocation18_spill] sm:$0xff] }
 0x1e2   : > { %v477_v50 = vperm.slane %v475_v35, 0 }
 0x1e4   : > { %494 = vperm.xlu1 %823, %v477_v50   ;;  %488 = vperm.xlu0 %822, %v477_v50  }
 0x1e5   : > { %482 = vperm.xlu2 %821, %v477_v50  }
 0x1ec   : > { %826 = vset.pattern.permute.xlu1 %v510_v20  ;;  %829 = vset.pattern.permute.xlu0 %v522_v38  ;;  %v1577_v20 = vld [vmem:[#allocation22_spill] sm:$0xff] }
 0x1ed   : > { %824 = vset.pattern.permute.xlu2 %v498_v6 }
 0x1f4   : > { %512 = vperm.xlu1 %826, %v477_v50  }
 0x1f5   : > { %500 = vperm.xlu2 %824, %v477_v50  }
 0x1fc   : > { %828 = vset.pattern.permute.xlu1 %v522_v38  ;;  %v1578_v38 = vld [vmem:[#allocation25_spill] sm:$0xff] }
 0x1fd   : > { %825 = vset.pattern.permute.xlu2 %v504_v52 }
 0x204   : > { %524 = vperm.xlu1 %828, %v477_v50  }
 0x205   : > { %506 = vperm.xlu2 %825, %v477_v50  }
 0x20d   : > { %827 = vset.pattern.permute.xlu2 %v516_v53  ;;  %v1579_v53 = vld [vmem:[#allocation12_spill] sm:$0xff] }
 0x215   : > { %518 = vperm.xlu2 %827, %v477_v50  }
 0x23f   : > { %v483_v59 = vpop.permute.xlu2 %482 }
 0x240   : > { %v526_v49 = vmul.f32 %v483_v59, %v1055_v0  ;;  %v527_v46 = vmul.f32 %v483_v59, %v1058_v1  ;;  %v528_v11 = vmul.f32 %v483_v59, %v1061_v2  ;;  %v529_v56 = vmul.f32 %v483_v59, %v1066_v4 }
 0x241   : > { %v530_v18 = vmul.f32 %v483_v59, %v1079_v9  ;;  %v531_v0 = vmul.f32 %v483_v59, %v1094_v15  ;;  %v532_v1 = vmul.f32 %v483_v59, %v1103_v19  ;;  %v533_v2 = vmul.f32 %v483_v59, %v1124_v28 }
 0x242   : > { %590 = vst [vmem:[%s1355_s7] sm:$0xff] %v526_v49  ;;  %v1580_v49 = vld [vmem:[#allocation13_spill] sm:$0xff] }
 0x243   : > { %591 = vst [vmem:[%s1355_s7 + $0x8] sm:$0xff] %v527_v46 }
 0x244   : > { %592 = vst [vmem:[%s1355_s7 + $0x10] sm:$0xff] %v528_v11  ;;  %v1581_v11 = vld [vmem:[#allocation14_spill] sm:$0xff] }
 0x245   : > { %593 = vst [vmem:[%s1355_s7 + $0x18] sm:$0xff] %v529_v56 }
 0x246   : > { %594 = vst [vmem:[%s1355_s7 + $0x20] sm:$0xff] %v530_v18  ;;  %v1582_v18 = vld [vmem:[#allocation16_spill] sm:$0xff] }
 0x247   : > { %595 = vst [vmem:[%s1355_s7 + $0x28] sm:$0xff] %v531_v0 }
 0x248   : > { %596 = vst [vmem:[%s1355_s7 + $0x30] sm:$0xff] %v532_v1  ;;  %v1583_v1 = vld [vmem:[#allocation21_spill] sm:$0xff] }
 0x249   : > { %597 = vst [vmem:[%s1355_s7 + $0x38] sm:$0xff] %v533_v2 }
 0x24f   : > { %v501_v4 = vpop.permute.xlu2 %500 }
 0x250   : > { %v550_v9 = vmul.f32 %v501_v4, %v1144_v37  ;;  %v551_v15 = vmul.f32 %v501_v4, %v1152_v41  ;;  %v552_v19 = vmul.f32 %v501_v4, %v1155_v42  ;;  %v553_v3 = vmul.f32 %v501_v4, %v1173_v51 }
 0x251   : > { %v554_v28 = vmul.f32 %v501_v4, %v1200_v63  ;;  %v555_v62 = vmul.f32 %v501_v4, %v1223_v32  ;;  %v556_v54 = vmul.f32 %v501_v4, %v1232_v40  ;;  %v557_v37 = vmul.f32 %v501_v4, %v1262_v29  ;;  %v1584_v4 = vld [vmem:[#allocation24_spill] sm:$0xff] }
 0x252   : > { %614 = vst [vmem:[%s1355_s7 + $0xc0] sm:$0xff] %v550_v9 }
 0x253   : > { %615 = vst [vmem:[%s1355_s7 + $0xc8] sm:$0xff] %v551_v15 }
 0x254   : > { %616 = vst [vmem:[%s1355_s7 + $0xd0] sm:$0xff] %v552_v19  ;;  %v1585_v19 = vld [vmem:[#allocation27_spill] sm:$0xff] }
 0x255   : > { %617 = vst [vmem:[%s1355_s7 + $0xd8] sm:$0xff] %v553_v3 }
 0x256   : > { %618 = vst [vmem:[%s1355_s7 + $0xe0] sm:$0xff] %v554_v28  ;;  %v495_v41 = vpop.permute.xlu1 %494  ;;  %v489_v10 = vpop.permute.xlu0 %488  ;;  %v1586_v28 = vld [vmem:[#allocation29_spill] sm:$0xff] }
 0x257   : > { %619 = vst [vmem:[%s1355_s7 + $0xe8] sm:$0xff] %v555_v62  ;;  %v542_v42 = vmul.f32 %v495_v41, %v1069_v5  ;;  %v543_v51 = vmul.f32 %v495_v41, %v1073_v7  ;;  %v544_v63 = vmul.f32 %v495_v41, %v1076_v8  ;;  %v545_v32 = vmul.f32 %v495_v41, %v1085_v12 }
 0x258   : > { %620 = vst [vmem:[%s1355_s7 + $0xf0] sm:$0xff] %v556_v54  ;;  %v546_v40 = vmul.f32 %v495_v41, %v1107_v21  ;;  %v547_v29 = vmul.f32 %v495_v41, %v1128_v30  ;;  %v548_v5 = vmul.f32 %v495_v41, %v1136_v33  ;;  %v549_v7 = vmul.f32 %v495_v41, %v1158_v43  ;;  %v1587_v54 = vld [vmem:[#allocation17_spill] sm:$0xff]  ;;  %v1588_v41 = vld [vmem:[#allocation19_spill] sm:$0xff] }
 0x259   : > { %621 = vst [vmem:[%s1355_s7 + $0xf8] sm:$0xff] %v557_v37  ;;  %v534_v8 = vmul.f32 %v489_v10, %v1115_v25  ;;  %v535_v12 = vmul.f32 %v489_v10, %v1118_v26  ;;  %v536_v21 = vmul.f32 %v489_v10, %v1121_v27  ;;  %v537_v30 = vmul.f32 %v489_v10, %v1141_v36 }
 0x25a   : > { %606 = vst [vmem:[%s1355_s7 + $0x80] sm:$0xff] %v542_v42  ;;  %v538_v33 = vmul.f32 %v489_v10, %v1166_v47  ;;  %v539_v43 = vmul.f32 %v489_v10, %v1187_v57  ;;  %v540_v26 = vmul.f32 %v489_v10, %v1196_v61  ;;  %v541_v23 = vmul.f32 %v489_v10, %v1219_v24 }
 0x25b   : > { %607 = vst [vmem:[%s1355_s7 + $0x88] sm:$0xff] %v543_v51  ;;  %v1589_v51 = vld [vmem:[#allocation20_spill] sm:$0xff] }
 0x25c   : > { %608 = vst [vmem:[%s1355_s7 + $0x90] sm:$0xff] %v544_v63 }
 0x25d   : > { %609 = vst [vmem:[%s1355_s7 + $0x98] sm:$0xff] %v545_v32  ;;  %v1590_v32 = vld [vmem:[#allocation23_spill] sm:$0xff] }
 0x25e   : > { %610 = vst [vmem:[%s1355_s7 + $0xa0] sm:$0xff] %v546_v40 }
 0x25f   : > { %611 = vst [vmem:[%s1355_s7 + $0xa8] sm:$0xff] %v547_v29  ;;  %v507_v25 = vpop.permute.xlu2 %506  ;;  %v1591_v29 = vld [vmem:[#allocation26_spill] sm:$0xff] }
 0x260   : > { %612 = vst [vmem:[%s1355_s7 + $0xb0] sm:$0xff] %v548_v5  ;;  %v558_v27 = vmul.f32 %v507_v25, %v1088_v13  ;;  %v559_v36 = vmul.f32 %v507_v25, %v1091_v14  ;;  %v560_v47 = vmul.f32 %v507_v25, %v1098_v17  ;;  %v561_v57 = vmul.f32 %v507_v25, %v1110_v22  ;;  %v1571_v17 = vld [vmem:[#allocation8_spill] sm:$0xff] }
 0x261   : > { %613 = vst [vmem:[%s1355_s7 + $0xb8] sm:$0xff] %v549_v7  ;;  %v562_v61 = vmul.f32 %v507_v25, %v1131_v31  ;;  %v563_v24 = vmul.f32 %v507_v25, %v1148_v39  ;;  %v564_v14 = vmul.f32 %v507_v25, %v1162_v45  ;;  %v565_v44 = vmul.f32 %v507_v25, %v1183_v55  ;;  %v1572_v31 = vld [vmem:[#allocation9_spill] sm:$0xff]  ;;  %v1573_v39 = vld [vmem:[#allocation10_spill] sm:$0xff]  ;;  %v1574_v45 = vld [vmem:[#allocation11_spill] sm:$0xff] }
 0x262   : > { %598 = vst [vmem:[%s1355_s7 + $0x40] sm:$0xff] %v534_v8  ;;  %v1592_v5 = vld [vmem:[#allocation28_spill] sm:$0xff]  ;;  %v1593_v8 = vld [vmem:[#allocation30_spill] sm:$0xff] }
 0x263   : > { %599 = vst [vmem:[%s1355_s7 + $0x48] sm:$0xff] %v535_v12 }
 0x264   : > { %600 = vst [vmem:[%s1355_s7 + $0x50] sm:$0xff] %v536_v21  ;;  %v1594_v21 = vld [vmem:[#allocation31_spill] sm:$0xff] }
 0x265   : > { %601 = vst [vmem:[%s1355_s7 + $0x58] sm:$0xff] %v537_v30 }
 0x266   : > { %602 = vst [vmem:[%s1355_s7 + $0x60] sm:$0xff] %v538_v33  ;;  %v513_v13 = vpop.permute.xlu1 %512 }
 0x267   : > { %603 = vst [vmem:[%s1355_s7 + $0x68] sm:$0xff] %v539_v43  ;;  %v566_v22 = vmul.f32 %v513_v13, %v1571_v17  ;;  %v567_v58 = vmul.f32 %v513_v13, %v1572_v31  ;;  %v568_v48 = vmul.f32 %v513_v13, %v1573_v39  ;;  %v569_v34 = vmul.f32 %v513_v13, %v1574_v45 }
 0x268   : > { %604 = vst [vmem:[%s1355_s7 + $0x70] sm:$0xff] %v540_v26  ;;  %v570_v55 = vmul.f32 %v513_v13, %v1575_v16  ;;  %v571_v35 = vmul.f32 %v513_v13, %v1576_v60  ;;  %v572_v6 = vmul.f32 %v513_v13, %v1577_v20  ;;  %v573_v52 = vmul.f32 %v513_v13, %v1578_v38 }
 0x269   : > { %605 = vst [vmem:[%s1355_s7 + $0x78] sm:$0xff] %v541_v23 }
 0x26a   : > { %622 = vst [vmem:[%s1355_s7 + $0x100] sm:$0xff] %v558_v27 }
 0x26b   : > { %623 = vst [vmem:[%s1355_s7 + $0x108] sm:$0xff] %v559_v36 }
 0x26c   : > { %624 = vst [vmem:[%s1355_s7 + $0x110] sm:$0xff] %v560_v47 }
 0x26d   : > { %625 = vst [vmem:[%s1355_s7 + $0x118] sm:$0xff] %v561_v57 }
 0x26e   : > { %626 = vst [vmem:[%s1355_s7 + $0x120] sm:$0xff] %v562_v61 }
 0x26f   : > { %627 = vst [vmem:[%s1355_s7 + $0x128] sm:$0xff] %v563_v24  ;;  %v519_v50 = vpop.permute.xlu2 %518 }
 0x270   : > { %628 = vst [vmem:[%s1355_s7 + $0x130] sm:$0xff] %v564_v14  ;;  %v574_v59 = vmul.f32 %v519_v50, %v1579_v53  ;;  %v575_v46 = vmul.f32 %v519_v50, %v1580_v49  ;;  %v576_v56 = vmul.f32 %v519_v50, %v1581_v11  ;;  %v577_v0 = vmul.f32 %v519_v50, %v1582_v18 }
 0x271   : > { %629 = vst [vmem:[%s1355_s7 + $0x138] sm:$0xff] %v565_v44  ;;  %v578_v2 = vmul.f32 %v519_v50, %v1583_v1  ;;  %v579_v9 = vmul.f32 %v519_v50, %v1584_v4  ;;  %v580_v3 = vmul.f32 %v519_v50, %v1585_v19  ;;  %v581_v62 = vmul.f32 %v519_v50, %v1586_v28 }
 0x272   : > { %630 = vst [vmem:[%s1355_s7 + $0x140] sm:$0xff] %v566_v22 }
 0x273   : > { %631 = vst [vmem:[%s1355_s7 + $0x148] sm:$0xff] %v567_v58 }
 0x274   : > { %632 = vst [vmem:[%s1355_s7 + $0x150] sm:$0xff] %v568_v48 }
 0x275   : > { %633 = vst [vmem:[%s1355_s7 + $0x158] sm:$0xff] %v569_v34 }
 0x276   : > { %634 = vst [vmem:[%s1355_s7 + $0x160] sm:$0xff] %v570_v55  ;;  %v525_v15 = vpop.permute.xlu1 %524 }
 0x277   : > { %635 = vst [vmem:[%s1355_s7 + $0x168] sm:$0xff] %v571_v35  ;;  %v582_v37 = vmul.f32 %v525_v15, %v1587_v54  ;;  %v583_v42 = vmul.f32 %v525_v15, %v1588_v41  ;;  %v584_v63 = vmul.f32 %v525_v15, %v1589_v51  ;;  %v585_v40 = vmul.f32 %v525_v15, %v1590_v32 }
 0x278   : > { %636 = vst [vmem:[%s1355_s7 + $0x170] sm:$0xff] %v572_v6  ;;  %v586_v10 = vmul.f32 %v525_v15, %v1591_v29  ;;  %v587_v7 = vmul.f32 %v525_v15, %v1592_v5  ;;  %v588_v12 = vmul.f32 %v525_v15, %v1593_v8  ;;  %v589_v30 = vmul.f32 %v525_v15, %v1594_v21 }
 0x279   : > { %637 = vst [vmem:[%s1355_s7 + $0x178] sm:$0xff] %v573_v52 }
 0x27a   : > { %638 = vst [vmem:[%s1355_s7 + $0x180] sm:$0xff] %v574_v59 }
 0x27b   : > { %639 = vst [vmem:[%s1355_s7 + $0x188] sm:$0xff] %v575_v46 }
 0x27c   : > { %640 = vst [vmem:[%s1355_s7 + $0x190] sm:$0xff] %v576_v56 }
 0x27d   : > { %641 = vst [vmem:[%s1355_s7 + $0x198] sm:$0xff] %v577_v0 }
 0x27e   : > { %642 = vst [vmem:[%s1355_s7 + $0x1a0] sm:$0xff] %v578_v2 }
 0x27f   : > { %643 = vst [vmem:[%s1355_s7 + $0x1a8] sm:$0xff] %v579_v9 }
 0x280   : > { %644 = vst [vmem:[%s1355_s7 + $0x1b0] sm:$0xff] %v580_v3 }
 0x281   : > { %645 = vst [vmem:[%s1355_s7 + $0x1b8] sm:$0xff] %v581_v62 }
 0x282   : > { %646 = vst [vmem:[%s1355_s7 + $0x1c0] sm:$0xff] %v582_v37 }
 0x283   : > { %647 = vst [vmem:[%s1355_s7 + $0x1c8] sm:$0xff] %v583_v42 }
 0x284   : > { %648 = vst [vmem:[%s1355_s7 + $0x1d0] sm:$0xff] %v584_v63 }
 0x285   : > { %649 = vst [vmem:[%s1355_s7 + $0x1d8] sm:$0xff] %v585_v40 }
 0x286   : > { %650 = vst [vmem:[%s1355_s7 + $0x1e0] sm:$0xff] %v586_v10 }
 0x287   : > { %651 = vst [vmem:[%s1355_s7 + $0x1e8] sm:$0xff] %v587_v7 }
 0x288   : > { %652 = vst [vmem:[%s1355_s7 + $0x1f0] sm:$0xff] %v588_v12 }
 0x289   : > { %653 = vst [vmem:[%s1355_s7 + $0x1f8] sm:$0xff] %v589_v30 }
 0x28a   : > { %891 = shalt.err (!%p888_p4)
}
 0x28b   : > { %s934_s29 = smov 1024   ;;  %s935_s6 = smov 64  }
 0x28c   : > { %773 = dma.vmem_to_hbm [thread:$0]  (%p1006_p11), %s668_s16, 8192, %s670_s11, %s655_s17, %s934_s29, %s934_s29, %s935_s6  }
 0x28d PF: > { %s684_s23 = sand.u32 1, %s918_s12   ;;  %p1595_p7 = scmp.ge.s32.totalorder %s930_s15, 2 }
 0x28e   : > { %s685_s5 = scalar_lea.sflag [#allocation4], %s684_s23 }
 0x28f   : > { %p780_p5 = pnand %p1595_p7, %p1010_p12 }
 0x291   : > { %p781_p8 = pneg %p780_p5 }
 0x293   : > { %913 = dma.done.wait (%p781_p8), %s685_s5, 8192  }
 0x294   : > { %915 = vsyncadd (%p781_p8), %s685_s5, 4294959104  ;;  %p16_p10 = scmp.ge.s32.totalorder %s981_s18, 4   ;;  %s1596_s12 = smov %s922_s13 }
 0x295   : > { %s1597_s13 = smov %s926_s14  ;;  %s1598_s14 = smov %s993_s21 }
 0x296   : > { %s1599_s15 = smov %s981_s18  ;;  %18 = sbr.rel (!%p16_p10) target bundleno = 5 (0x5), region = 77 }
 0x29b   :  { %691 = vsyncpa [#allocation3], 1 }
 0x29c   :  { %693 = vsyncpa [#allocation3 + $0x1], 1 }
 0x29d   :  { %694 = vsyncpa [#allocation4], 1 }
 0x29e   :  { %696 = vsyncpa [#allocation4 + $0x1], 1 }

</bundles_post_ra>
